<compile_context>
chip_gen: v7x
topology: tpu7x:2x2x1
jax: 0.10.0
libtpu: 0.0.40
codegen_flags: <defaults>
</compile_context>

<pallas_src>
import functools

import jax
import jax.numpy as jnp
import numpy as np
from jax.experimental import pallas as pl
from jax.experimental.pallas import tpu as pltpu


def _round_up(x, m):
    return (x + m - 1) // m * m


def rayen_fused_kernel(x_ref, wT_ref, b_ref, cat_ref, ypc_ref, y_ref):
    # Static split point of the fused weight: first Mp lanes are D.T (zero padded, Mp a
    # multiple of 128 so both slices of `s` are lane-aligned), last K lanes are NA_E.T.
    mp = cat_ref.shape[1] - ypc_ref.shape[1]

    # mapper: q = x @ W^T + b                                     (TB, N), f32 accumulate
    q = jnp.dot(x_ref[...], wT_ref[...],
                preferred_element_type=jnp.float32) + b_ref[...]

    # one fused constraint matmul: s = q @ [D.T_pad | NA_E.T]     (TB, Mp + K)
    s = jnp.dot(q, cat_ref[...], preferred_element_type=jnp.float32)

    # r = max_j (D @ q)_j  (zero-padded columns only add a 0 candidate, clamped below)
    r = jnp.max(s[:, :mp], axis=1, keepdims=True)                 # (TB, 1)

    # alpha * v_bar == q / max(r, 1)  ==> y = (q @ NA_E.T) * scale + (NA_E @ z0 + yp)
    scale = 1.0 / jnp.maximum(r, 1.0)                             # (TB, 1)

    y_ref[...] = s[:, mp:] * scale + ypc_ref[...]                 # (TB, K)


def prepare_rayen_params(W, b, D, NA_E, z0, yp):
    """One-time weight preprocessing, hoisted out of the per-call forward."""
    W = jnp.asarray(W, jnp.float32)
    b = jnp.asarray(b, jnp.float32)
    D = jnp.asarray(D, jnp.float32)
    NA_E = jnp.asarray(NA_E, jnp.float32)
    z0 = jnp.asarray(z0, jnp.float32).reshape(-1, 1)
    yp = jnp.asarray(yp, jnp.float32).reshape(-1, 1)

    N = W.shape[0]
    K = NA_E.shape[0]
    M = D.shape[0]

    # Pad the D block to a multiple of 128 lanes with zero columns so the NA_E block
    # starts on a vreg (lane) boundary inside the kernel.  Harmless for the math.
    Mp = _round_up(max(M, 1), 128)
    dT_pad = jnp.zeros((N, Mp), jnp.float32).at[:, :M].set(D.T)
    cat = jnp.concatenate([dT_pad, NA_E.T], axis=1)               # (N, Mp + K)
    ypc = (NA_E @ z0 + yp).reshape(1, K)                          # folded NA_E@z0 + yp

    return {"wT": W.T, "b": b.reshape(1, N), "cat": cat, "ypc": ypc}


# Conservative budget for per-step VMEM tile buffers; we request a 32 MiB scoped limit
# (<= default on v6e/v7x, a safe raise from 16 MiB on v5e, well under physical everywhere).
_VMEM_TILE_BUDGET = 24 * 1024 * 1024
_VMEM_LIMIT_BYTES = 32 * 1024 * 1024


def _choose_tb(B, IN, N, MpK, K, tb_max, x_bytes):
    """Batch-tile: >=512 rows/step (HBM roofline), >=2 grid steps (v7x 2 TCs),
    VMEM-budget aware for large IN, multiple of 16 (bf16 sublane packing)."""
    target_steps = 4
    tb = max(512, pl.cdiv(B, target_steps))          # enough rows/step for the roofline
    tb = min(tb, max(int(tb_max), 16))
    tb = min(tb, _round_up(pl.cdiv(B, 2), 16))       # keep >= 2 steps when batch allows
    tb = min(tb, _round_up(B, 16))                   # never (much) bigger than the batch
    kp = _round_up(K, 128)                           # y tile is lane-padded in VMEM
    weight_bytes = 2 * 4 * (IN * N + N * MpK + N + K)
    per_row = 2 * IN * x_bytes + 2 * kp * 4          # double-buffered x + y tiles
    tb = min(tb, max(16, (_VMEM_TILE_BUDGET - weight_bytes) // per_row))
    return int(max(16, (tb // 16) * 16))


@functools.partial(jax.jit, static_argnames=("tb", "use_bf16"))
def constraint_module_forward(x, wT, b, cat, ypc, *, tb=1024, use_bf16=False):
    """RAYEN forward. x: (B, ...) flattened to (B, IN). Returns (B, K, 1)."""
    B = x.shape[0]
    x_flat = x.reshape(B, -1)
    IN = x_flat.shape[1]
    N = wT.shape[1]
    K = ypc.shape[1]
    MpK = cat.shape[1]

    # Optional bf16 x-stream: halves the dominant HBM read (x); accumulation stays f32.
    x_dtype = jnp.bfloat16 if use_bf16 else jnp.float32
    x_bytes = np.dtype(x_dtype).itemsize
    x_flat = x_flat.astype(x_dtype)
    wT_k = wT.astype(x_dtype)                        # tiny resident weight, match dtype

    TB = _choose_tb(B, IN, N, MpK, K, tb, x_bytes)
    grid = (pl.cdiv(B, TB),)                         # ragged last block clipped by Pallas

    cost = pl.CostEstimate(
        flops=2 * B * (IN * N + N * MpK),
        transcendentals=0,
        bytes_accessed=B * (IN * x_bytes + K * 4) + 4 * (IN * N + N * MpK + N + K),
    )

    y = pl.pallas_call(
        rayen_fused_kernel,
        out_shape=jax.ShapeDtypeStruct((B, K), jnp.float32),
        grid_spec=pltpu.PrefetchScalarGridSpec(
            num_scalar_prefetch=0,
            grid=grid,
            in_specs=[
                pl.BlockSpec((TB, IN), lambda i: (i, 0)),   # x tile (pipelined stream)
                pl.BlockSpec((IN, N), lambda i: (0, 0)),    # W^T (resident)
                pl.BlockSpec((1, N), lambda i: (0, 0)),     # bias
                pl.BlockSpec((N, MpK), lambda i: (0, 0)),   # [D.T_pad | NA_E.T]
                pl.BlockSpec((1, K), lambda i: (0, 0)),     # NA_E @ z0 + yp
            ],
            # K < 128 -> masked stores; the lane-dense transposed alternative costs an
            # extra HBM pass over y in the wrapper, a net loss unless K << IN.
            out_specs=pl.BlockSpec((TB, K), lambda i: (i, 0)),
        ),
        compiler_params=pltpu.CompilerParams(
            dimension_semantics=("parallel",),
            vmem_limit_bytes=_VMEM_LIMIT_BYTES,
        ),
        cost_estimate=cost,
    )(x_flat, wT_k, b, cat, ypc)

    return y.reshape(B, K, 1)


if __name__ == "__main__":
    # Constraint set: k=32 (ambient), n=16 (subspace), M=24 linear inequalities,
    # mapper input_dim=32.  B=300 is deliberately NOT a multiple of the batch tile:
    # TB auto-selects 160 -> grid of 2 steps (both v7x TCs) with a ragged last block,
    # exercising the no-pad / no-slice path.
    B, IN, N, K, M = 300, 32, 16, 32, 24
    key = jax.random.PRNGKey(0)
    ks = jax.random.split(key, 8)

    # Small-integer test data (exact in bf16/f32) so the kernel vs float64-reference
    # comparison below is tight regardless of how the MXU rounds operands.
    x = jax.random.randint(ks[0], (B, 4, 8), -2, 3).astype(jnp.float32)     # flattens to (B, 32)
    W = jax.random.randint(ks[1], (N, IN), -2, 3).astype(jnp.float32)       # nn.Linear weight
    b = jax.random.randint(ks[2], (N,), -3, 4).astype(jnp.float32)          # nn.Linear bias

    # Linear inequalities A_p z <= b_p with strict interior point z0 = 0.
    A_p = jax.random.randint(ks[3], (M, N), -2, 3).astype(jnp.float32)
    b_p = jnp.full((M, 1), 2.0, jnp.float32)
    z0 = jnp.zeros((N, 1), jnp.float32)
    D = A_p / (b_p - A_p @ z0)                                              # per-row scaling

    # Equality-constraint null-space map and particular solution.
    NA_E = jax.random.randint(ks[4], (K, N), -2, 3).astype(jnp.float32)
    yp = jax.random.randint(ks[5], (K, 1), -3, 4).astype(jnp.float32)

    params = prepare_rayen_params(W, b, D, NA_E, z0, yp)
    y = constraint_module_forward(x, params["wT"], params["b"],
                                  params["cat"], params["ypc"])
    y = jax.block_until_ready(y)
    assert y.shape == (B, K, 1)
    assert not bool(jnp.isnan(y).any())

    # float64 reference mirroring the PyTorch forwardForRAYEN path exactly.
    xf = np.asarray(x, np.float64).reshape(B, -1)
    W64 = np.asarray(W, np.float64)
    b64 = np.asarray(b, np.float64)
    D64 = np.asarray(D, np.float64)
    NA64 = np.asarray(NA_E, np.float64)
    z064 = np.asarray(z0, np.float64)
    yp64 = np.asarray(yp, np.float64)

    q = xf @ W64.T + b64                                        # (B, N)
    norm_v = np.linalg.norm(q, axis=1, keepdims=True)           # (B, 1)
    v_bar = q / np.maximum(norm_v, 1e-12)                       # F.normalize(dim=1)
    kappa = np.maximum((v_bar @ D64.T).max(axis=1, keepdims=True), 0.0)
    with np.errstate(divide="ignore"):
        alpha = np.minimum(np.divide(1.0, kappa), norm_v)       # min(1/kappa, ||v||)
    y_ref = (z064.T + alpha * v_bar) @ NA64.T + yp64.T          # NA_E@(z0+alpha v_bar)+yp

    np.testing.assert_allclose(np.asarray(y)[:, :, 0], y_ref, rtol=1e-5, atol=1e-5)

    # bf16 x-stream variant (halves the dominant HBM read).  Integer test data is exact
    # in bf16, but check with a looser tolerance to reflect general-case accuracy.
    y_bf16 = jax.block_until_ready(
        constraint_module_forward(x, params["wT"], params["b"],
                                  params["cat"], params["ypc"], use_bf16=True))
    assert y_bf16.shape == (B, K, 1)
    np.testing.assert_allclose(np.asarray(y_bf16)[:, :, 0], y_ref, rtol=2e-2, atol=2e-2)

    print("KERNEL_OK")
</pallas_src>

<mosaic_0001>
module attributes {stable_mosaic.version = 11 : i64} {
  func.func @rayen_fused_kernel(%arg0: i32, %arg1: memref<160x32xf32, #tpu.memory_space<vmem>>, %arg2: memref<32x16xf32, #tpu.memory_space<vmem>>, %arg3: memref<1x16xf32, #tpu.memory_space<vmem>>, %arg4: memref<16x160xf32, #tpu.memory_space<vmem>>, %arg5: memref<1x32xf32, #tpu.memory_space<vmem>>, %arg6: memref<160x32xf32, #tpu.memory_space<vmem>>) attributes {dimension_semantics = [#tpu.dimension_semantics<parallel>], iteration_bounds = array<i64: 2>, scalar_prefetch = 0 : i64, scratch_operands = 0 : i64, tpu.core_type = #tpu.core_type<tc>, window_params = [{transform_indices = @transform_0, window_bounds = array<i64: 160, 32>}, {pipeline_mode = #tpu.pipeline_mode<synchronous>, transform_indices = @transform_1, window_bounds = array<i64: 32, 16>}, {pipeline_mode = #tpu.pipeline_mode<synchronous>, transform_indices = @transform_2, window_bounds = array<i64: 1, 16>}, {pipeline_mode = #tpu.pipeline_mode<synchronous>, transform_indices = @transform_3, window_bounds = array<i64: 16, 160>}, {pipeline_mode = #tpu.pipeline_mode<synchronous>, transform_indices = @transform_4, window_bounds = array<i64: 1, 32>}, {transform_indices = @transform_5, window_bounds = array<i64: 160, 32>}]} {
    %c0 = arith.constant 0 : index
    %c0_0 = arith.constant 0 : index
    %0 = vector.load %arg1[%c0, %c0_0] : memref<160x32xf32, #tpu.memory_space<vmem>>, vector<160x32xf32>
    %c0_1 = arith.constant 0 : index
    %c0_2 = arith.constant 0 : index
    %1 = vector.load %arg2[%c0_1, %c0_2] : memref<32x16xf32, #tpu.memory_space<vmem>>, vector<32x16xf32>
    %cst = arith.constant dense<0.000000e+00> : vector<160x16xf32>
    %2 = tpu.matmul %0, %1, %cst {dimension_numbers = #tpu.dot_dimension_numbers<[1], [0], [0], [1], [0, 0, 1, 1], [], []>} : vector<160x32xf32>, vector<32x16xf32>, vector<160x16xf32> -> vector<160x16xf32>
    %c0_3 = arith.constant 0 : index
    %c0_4 = arith.constant 0 : index
    %3 = vector.load %arg3[%c0_3, %c0_4] : memref<1x16xf32, #tpu.memory_space<vmem>>, vector<1x16xf32>
    %4 = vector.broadcast %3 : vector<1x16xf32> to vector<160x16xf32>
    %5 = arith.addf %2, %4 : vector<160x16xf32>
    %c0_5 = arith.constant 0 : index
    %c0_6 = arith.constant 0 : index
    %6 = vector.load %arg4[%c0_5, %c0_6] : memref<16x160xf32, #tpu.memory_space<vmem>>, vector<16x160xf32>
    %cst_7 = arith.constant dense<0.000000e+00> : vector<160x160xf32>
    %7 = tpu.matmul %5, %6, %cst_7 {dimension_numbers = #tpu.dot_dimension_numbers<[1], [0], [0], [1], [0, 0, 1, 1], [], []>} : vector<160x16xf32>, vector<16x160xf32>, vector<160x160xf32> -> vector<160x160xf32>
    %8 = vector.extract_strided_slice %7 {offsets = [0, 0], sizes = [160, 128], strides = [1, 1]} : vector<160x160xf32> to vector<160x128xf32>
    %cst_8 = arith.constant dense<0xFF800000> : vector<160xf32>
    %9 = vector.multi_reduction <maximumf>, %8, %cst_8 [1] : vector<160x128xf32> to vector<160xf32>
    %10 = vector.shape_cast %9 : vector<160xf32> to vector<160x1xf32>
    %cst_9 = arith.constant 1.000000e+00 : f32
    %11 = vector.broadcast %cst_9 : f32 to vector<160x1xf32>
    %12 = arith.maximumf %10, %11 : vector<160x1xf32>
    %cst_10 = arith.constant 1.000000e+00 : f32
    %13 = vector.broadcast %cst_10 : f32 to vector<160x1xf32>
    %14 = arith.divf %13, %12 : vector<160x1xf32>
    %15 = vector.extract_strided_slice %7 {offsets = [0, 128], sizes = [160, 32], strides = [1, 1]} : vector<160x160xf32> to vector<160x32xf32>
    %16 = vector.broadcast %14 : vector<160x1xf32> to vector<160x32xf32>
    %17 = arith.mulf %15, %16 : vector<160x32xf32>
    %c0_11 = arith.constant 0 : index
    %c0_12 = arith.constant 0 : index
    %18 = vector.load %arg5[%c0_11, %c0_12] : memref<1x32xf32, #tpu.memory_space<vmem>>, vector<1x32xf32>
    %19 = vector.broadcast %18 : vector<1x32xf32> to vector<160x32xf32>
    %20 = arith.addf %17, %19 : vector<160x32xf32>
    %c0_13 = arith.constant 0 : index
    %c0_14 = arith.constant 0 : index
    %21 = vector.load %arg6[%c0_13, %c0_14] : memref<160x32xf32, #tpu.memory_space<vmem>>, vector<160x32xf32>
    tpu.vector_store %arg6[%c0_13, %c0_14], %20 {strides = array<i32>} : memref<160x32xf32, #tpu.memory_space<vmem>>, vector<160x32xf32>,
    return
  }
  func.func @transform_0(%arg0: i32) -> (i32, i32) {
    %c0_i32 = arith.constant 0 : i32
    %c0_i32_0 = arith.constant 0 : i32
    return %arg0, %c0_i32 : i32, i32
  }
  func.func @transform_1(%arg0: i32) -> (i32, i32) {
    %c0_i32 = arith.constant 0 : i32
    %c0_i32_0 = arith.constant 0 : i32
    %c0_i32_1 = arith.constant 0 : i32
    return %c0_i32, %c0_i32_0 : i32, i32
  }
  func.func @transform_2(%arg0: i32) -> (i32, i32) {
    %c0_i32 = arith.constant 0 : i32
    %c0_i32_0 = arith.constant 0 : i32
    %c0_i32_1 = arith.constant 0 : i32
    return %c0_i32, %c0_i32_0 : i32, i32
  }
  func.func @transform_3(%arg0: i32) -> (i32, i32) {
    %c0_i32 = arith.constant 0 : i32
    %c0_i32_0 = arith.constant 0 : i32
    %c0_i32_1 = arith.constant 0 : i32
    return %c0_i32, %c0_i32_0 : i32, i32
  }
  func.func @transform_4(%arg0: i32) -> (i32, i32) {
    %c0_i32 = arith.constant 0 : i32
    %c0_i32_0 = arith.constant 0 : i32
    %c0_i32_1 = arith.constant 0 : i32
    return %c0_i32, %c0_i32_0 : i32, i32
  }
  func.func @transform_5(%arg0: i32) -> (i32, i32) {
    %c0_i32 = arith.constant 0 : i32
    %c0_i32_0 = arith.constant 0 : i32
    return %arg0, %c0_i32 : i32, i32
  }
}

</mosaic_0001>

<bundles_post_ra>
// kernel: constraint_module_forward.1
= control target key start
LH: loop header
LB: loop body
LE: loop exit
PB: predicated region body
PF: predicated region fallthrough
CT: control target
= control target key end

     0   :  { %s1603_s18 = smov 0   ;;  %s1605_s19 = smov 0   ;;  %s2002_s0 = inlined_call_operand.vmem [shape: f32[300,32], index: 0, kind: input, shape index: {}]   ;;  %s2003_s1 = inlined_call_operand.vmem [shape: f32[32,16], index: 1, kind: input, shape index: {}]   ;;  %s2004_s2 = inlined_call_operand.vmem [shape: f32[1,16], index: 2, kind: input, shape index: {}]   ;;  %s2005_s3 = inlined_call_operand.vmem [shape: f32[16,160], index: 3, kind: input, shape index: {}]   ;;  %s2006_s4 = inlined_call_operand.vmem [shape: f32[1,32], index: 4, kind: input, shape index: {}]   ;;  %s2007_s5 = inlined_call_operand.vmem [shape: f32[300,32], index: 5, kind: output, shape index: {}]  }
   0x1   :  { %s1607_s20 = smov 0  }
   0x2 LB: > { %s1616_s21 = sadd.s32 4294967295, %s1538_s20   ;;  %s1618_s22 = sadd.s32 1, %s1538_s20   ;;  %s1538_s20 = sphi %s1607_s20, %s2014_s20   ;;  %s1534_s19 = sphi %s1605_s19, %s2013_s19   ;;  %s1530_s18 = sphi %s1603_s18, %s2012_s18  }
   0x3   : > { %s129_s23 = ssub.s32 %s1538_s20, %s1618_s22  ;;  %s132_s24 = sadd.s32 1, %s1534_s19 }
   0x4   : > { %p130_p0 = scmp.eq.s32.totalorder %s129_s23, 0  ;;  %p142_p1 = scmp.ne.s32.totalorder %s1534_s19, %s1530_s18 }
   0x5   : > { %p143_p2 = scmp.eq.s32.totalorder %s1616_s21, 1  ;;  %p1216_p3 = scmp.ge.s32.totalorder %s1538_s20, 1 }
   0x6   : > { %s1626_s25 = scalar_select %p130_p0, %s1534_s19, %s132_s24  }
   0x7   : > { %p1628_p4 = por %p143_p2, %p142_p1  ;;  %p196_p5 = scmp.lt.s32.totalorder %s1538_s20, 3 }
   0x9   : > { %p197_p6 = pnand %p1216_p3, %p196_p5 }
   0xa   : > { %v266_v0 = vld [vmem:[%s2003_s1] sm:$0xff] (!%p197_p6)  ;;  %v267_v1 = vld [vmem:[%s2003_s1 + $0x8] sm:$0xff] (!%p197_p6)  ;;  %v268_v2 = vld [vmem:[%s2003_s1 + $0x10] sm:$0xff] (!%p197_p6)  ;;  %s1642_s8 = smul.u32 (!%p197_p6), 20, %s1616_s21  ;;  %vm277_vm0 = vcmask (!%p197_p6), 261120   ;;  %v1572_v32 = vmov (!%p197_p6), 0.0  }
   0xb   : > { %200 = sbr.rel (%p197_p6) target bundleno = 742 (0x2e6), region = 40  ;;  %v1335_v3 = vpack.c.bf16 (!%p197_p6), %v267_v1, %v266_v0  ;;  %v269_v4 = vld [vmem:[%s2003_s1 + $0x18] sm:$0xff] (!%p197_p6)  ;;  %v504_v5 = vld [vmem:[%s2005_s3 + $0x8] sm:$0xff] (!%p197_p6)  ;;  %v503_v9 = vld [vmem:[%s2005_s3] sm:$0xff] (!%p197_p6)  ;;  %656 = vmatprep.mubr.f32.mxu1 (!%p197_p6), %v1572_v32  ;;  %vm507_vm1 = vcmask (!%p197_p6), 130048   ;;  %s224_s7 = sand.u32 (!%p197_p6), 1, %s1530_s18  }
   0xc   : > { %v506_v6 = vld [vmem:[%s2005_s3 + $0x18] sm:$0xff] (!%p197_p6)  ;;  %v1339_v7 = vpack.c.bf16 (!%p197_p6), %v269_v4, %v268_v2  ;;  %p232_p7 = scmp.lt.s32.totalorder (!%p197_p6), %s1642_s8, 37  ;;  %v505_v10 = vld [vmem:[%s2005_s3 + $0x10] sm:$0xff] (!%p197_p6)  ;;  %v1711_v33 = vld [vmem:[%s2004_s2] ss:$0 sm:$0xff] (!%p197_p6)  ;;  %s1349_s9 = smul.u32 (!%p197_p6), 160, %s224_s7 }
   0xd   : > { %v1343_v8 = vpack.c.bf16 (!%p197_p6), %v506_v6, %v504_v5  ;;  %1336 = vmatprep.subr.bf16.mxu0 (!%p197_p6), %v1335_v3  ;;  %v1345_v11 = vpack.c.bf16 (!%p197_p6), %v505_v10, %v503_v9 }
   0xe   : > { %1338 = vmatpush3.bf16.msra.mxu0 (!%p197_p6), %v1335_v3  ;;  %s1819_s18 = scalar_lea.vmem (!%p197_p6), [#allocation2], %s1349_s9  }
   0xf   : > { %1347 = vmatprep.subr.bf16.mxu1 (!%p197_p6), %v1343_v8  ;;  %1340 = vmatprep.subr.bf16.mxu0 (!%p197_p6), %v1339_v7 }
  0x10   : > { %1348 = vmatpush1.bf16.msra.mxu1 (!%p197_p6), %v1345_v11 }
  0x12   : > { %s233_s23 = scalar_select %p232_p7, %s1642_s8, 37  ;;  %1342 = vmatpush3.bf16.msra.mxu0 %v1339_v7 }
  0x13   : > { %1344 = vmatprep.subr.bf16.mxu0 %v1343_v8  ;;  %s928_s12 = ssub.s32 (%p1628_p4), 38, %s1642_s8  ;;  %s1272_s13 = smul.u32 (%p1628_p4), 160, %s1616_s21 }
  0x14   : > { %s1217_s24 = sshll.u32 %s233_s23, 3  ;;  %p929_p8 = scmp.lt.s32.totalorder (%p1628_p4), %s928_s12, 20 }
  0x15   : > { %s1664_s29 = scalar_lea.vmem %s2002_s0, %s1217_s24  ;;  %s1906_s16 = scalar_lea.vmem (%p1628_p4), %s2007_s5, %s1272_s13  }
  0x16   : > { %v246_v12 = vld [vmem:[%s1664_s29] sm:$0xff]  ;;  %v247_v13 = vld [vmem:[%s1664_s29 + $0x8] sm:$0xff]  ;;  %v248_v14 = vld [vmem:[%s1664_s29 + $0x10] sm:$0xff] }
  0x17   : > { %1305 = vmatprep.mubr.msk.f32.mxu0 %vm277_vm0, %v246_v12  ;;  %v249_v15 = vld [vmem:[%s1664_s29 + $0x18] sm:$0xff]  ;;  %v250_v16 = vld [vmem:[%s1664_s29 + $0x20] sm:$0xff]  ;;  %v251_v17 = vld [vmem:[%s1664_s29 + $0x28] sm:$0xff] }
  0x18   : > { %1306 = vmatmul.mubr.msk.f32.vlgmr.msra.gmra.mrb[0].mxu0 %vm277_vm0, %v247_v13  ;;  %v252_v18 = vld [vmem:[%s1664_s29 + $0x30] sm:$0xff]  ;;  %v253_v19 = vld [vmem:[%s1664_s29 + $0x38] sm:$0xff]  ;;  %v254_v20 = vld [vmem:[%s1664_s29 + $0x40] sm:$0xff] }
  0x19   : > { %1308 = vmatprep.mubr.msk.f32.mxu0 %vm277_vm0, %v248_v14  ;;  %1346 = vmatpush1.bf16.msra.mxu0 %v1345_v11  ;;  %v255_v21 = vld [vmem:[%s1664_s29 + $0x48] sm:$0xff]  ;;  %v256_v22 = vld [vmem:[%s1664_s29 + $0x50] sm:$0xff]  ;;  %v257_v23 = vld [vmem:[%s1664_s29 + $0x58] sm:$0xff] }
  0x1a   : > { %v258_v24 = vld [vmem:[%s1664_s29 + $0x60] sm:$0xff]  ;;  %v259_v25 = vld [vmem:[%s1664_s29 + $0x68] sm:$0xff]  ;;  %v260_v26 = vld [vmem:[%s1664_s29 + $0x70] sm:$0xff] }
  0x1b   : > { %v261_v27 = vld [vmem:[%s1664_s29 + $0x78] sm:$0xff]  ;;  %v262_v28 = vld [vmem:[%s1664_s29 + $0x80] sm:$0xff]  ;;  %v263_v29 = vld [vmem:[%s1664_s29 + $0x88] sm:$0xff] }
  0x1c   : > { %1309 = vmatmul.mubr.msk.f32.gmra.mrb[2].mxu0 %vm277_vm0, %v249_v15  ;;  %v264_v30 = vld [vmem:[%s1664_s29 + $0x90] sm:$0xff]  ;;  %v265_v31 = vld [vmem:[%s1664_s29 + $0x98] sm:$0xff] }
  0x1d   : > { %1311 = vmatprep.mubr.msk.f32.mxu0 %vm277_vm0, %v250_v16 }
  0x20   : > { %1312 = vmatmul.mubr.msk.f32.gmra.mrb[4].mxu0 %vm277_vm0, %v251_v17 }
  0x21   : > { %1314 = vmatprep.mubr.msk.f32.mxu0 %vm277_vm0, %v252_v18 }
  0x24   : > { %1315 = vmatmul.mubr.msk.f32.gmra.mrb[6].mxu0 %vm277_vm0, %v253_v19 }
  0x25   : > { %1317 = vmatprep.mubr.msk.f32.mxu0 %vm277_vm0, %v254_v20 }
  0x28   : > { %1318 = vmatmul.mubr.msk.f32.gmra.mrb[8].mxu0 %vm277_vm0, %v255_v21 }
  0x29   : > { %1320 = vmatprep.mubr.msk.f32.mxu0 %vm277_vm0, %v256_v22 }
  0x2c   : > { %1321 = vmatmul.mubr.msk.f32.gmra.mrb[10].mxu0 %vm277_vm0, %v257_v23 }
  0x2d   : > { %1323 = vmatprep.mubr.msk.f32.mxu0 %vm277_vm0, %v258_v24 }
  0x30   : > { %1324 = vmatmul.mubr.msk.f32.gmra.mrb[12].mxu0 %vm277_vm0, %v259_v25 }
  0x31   : > { %1326 = vmatprep.mubr.msk.f32.mxu0 %vm277_vm0, %v260_v26 }
  0x34   : > { %1327 = vmatmul.mubr.msk.f32.gmra.mrb[14].mxu0 %vm277_vm0, %v261_v27 }
  0x35   : > { %1329 = vmatprep.mubr.msk.f32.mxu0 %vm277_vm0, %v262_v28 }
  0x38   : > { %1330 = vmatmul.mubr.msk.f32.gmra.mrb[16].mxu0 %vm277_vm0, %v263_v29 }
  0x39   : > { %1332 = vmatprep.mubr.msk.f32.mxu0 %vm277_vm0, %v264_v30 }
  0x3c   : > { %1333 = vmatmul.mubr.msk.f32.gmra.mrb[18].mxu0 %vm277_vm0, %v265_v31 }
  0x3d   : > { %632 = vmatprep.mubr.f32.mxu0 %v1572_v32 }
  0xeb   : > { %v1307_v34 = vpop.f32.mrb[0].mxu0 }
  0xec   : > { %v404_v35 = vpop.f32.mrb[1].mxu0  ;;  %v410_v39 = vadd.f32 %v1307_v34, %v1711_v33 }
  0xed   : > { %v405_v36 = vadd.f32 %v1711_v33, %v404_v35 }
  0xef   : > { %v1310_v37 = vpop.f32.mrb[2].mxu0  ;;  %1239 = vmatmul.mubr.msk.f32.vlgmr.msra.gmra.mrb[20].mxu0 %vm507_vm1, %v405_v36 }
  0xf0   : > { %v414_v38 = vpop.f32.mrb[3].mxu0  ;;  %638 = vmatprep.mubr.f32.mxu0 %v1572_v32  ;;  %v420_v46 = vadd.f32 %v1310_v37, %v1711_v33 }
  0xf1   : > { %v415_v42 = vadd.f32 %v1711_v33, %v414_v38 }
  0xf3   : > { %v1313_v40 = vpop.f32.mrb[4].mxu0  ;;  %1240 = vmatmul.mubr.msk.f32.gmra.mrb[22].mxu0 %vm507_vm1, %v410_v39 }
  0xf4   : > { %v424_v41 = vpop.f32.mrb[5].mxu0  ;;  %644 = vmatprep.mubr.f32.mxu0 %v1572_v32  ;;  %v430_v47 = vadd.f32 %v1313_v40, %v1711_v33 }
  0xf5   : > { %v425_v43 = vadd.f32 %v1711_v33, %v424_v41 }
  0xf7   : > { %1241 = vmatmul.mubr.msk.f32.gmra.mrb[24].mxu0 %vm507_vm1, %v415_v42  ;;  %1243 = vmatmul.mubr.msk.f32.vlgmr.msra.gmra.mrb[0].mxu1 %vm507_vm1, %v425_v43  ;;  %v1316_v44 = vpop.f32.mrb[6].mxu0 }
  0xf8   : > { %650 = vmatprep.mubr.f32.mxu0 %v1572_v32  ;;  %662 = vmatprep.mubr.f32.mxu1 %v1572_v32  ;;  %v434_v45 = vpop.f32.mrb[7].mxu0  ;;  %v440_v53 = vadd.f32 %v1316_v44, %v1711_v33 }
  0xf9   : > { %v435_v48 = vadd.f32 %v1711_v33, %v434_v45 }
  0xfb   : > { %1242 = vmatmul.mubr.msk.f32.gmra.mrb[26].mxu0 %vm507_vm1, %v420_v46  ;;  %1244 = vmatmul.mubr.msk.f32.gmra.mrb[2].mxu1 %vm507_vm1, %v430_v47  ;;  %v1319_v49 = vpop.f32.mrb[8].mxu0 }
  0xfc   : > { %668 = vmatprep.mubr.f32.mxu1 %v1572_v32  ;;  %v444_v50 = vpop.f32.mrb[9].mxu0  ;;  %v450_v59 = vadd.f32 %v1319_v49, %v1711_v33 }
  0xfd   : > { %v445_v54 = vadd.f32 %v1711_v33, %v444_v50 }
  0xff   : > { %1245 = vmatmul.mubr.msk.f32.gmra.mrb[4].mxu1 %vm507_vm1, %v435_v48  ;;  %v1322_v51 = vpop.f32.mrb[10].mxu0 }
 0x100   : > { %674 = vmatprep.mubr.f32.mxu1 %v1572_v32  ;;  %v454_v52 = vpop.f32.mrb[11].mxu0  ;;  %v460_v2 = vadd.f32 %v1322_v51, %v1711_v33 }
 0x101   : > { %v455_v60 = vadd.f32 %v1711_v33, %v454_v52 }
 0x103   : > { %1246 = vmatmul.mubr.msk.f32.gmra.mrb[6].mxu1 %vm507_vm1, %v440_v53  ;;  %v1325_v55 = vpop.f32.mrb[12].mxu0 }
 0x104   : > { %680 = vmatprep.mubr.f32.mxu1 %v1572_v32  ;;  %v464_v56 = vpop.f32.mrb[13].mxu0  ;;  %v470_v5 = vadd.f32 %v1325_v55, %v1711_v33 }
 0x105   : > { %v465_v4 = vadd.f32 %v1711_v33, %v464_v56 }
 0x107   : > { %1247 = vmatmul.mubr.msk.f32.gmra.mrb[8].mxu1 %vm507_vm1, %v445_v54  ;;  %v1328_v57 = vpop.f32.mrb[14].mxu0 }
 0x108   : > { %686 = vmatprep.mubr.f32.mxu1 %v1572_v32  ;;  %v474_v58 = vpop.f32.mrb[15].mxu0  ;;  %v480_v7 = vadd.f32 %v1328_v57, %v1711_v33 }
 0x109   : > { %v475_v6 = vadd.f32 %v1711_v33, %v474_v58 }
 0x10b   : > { %1248 = vmatmul.mubr.msk.f32.gmra.mrb[10].mxu1 %vm507_vm1, %v450_v59  ;;  %v1331_v61 = vpop.f32.mrb[16].mxu0 }
 0x10c   : > { %692 = vmatprep.mubr.f32.mxu1 %v1572_v32  ;;  %v484_v62 = vpop.f32.mrb[17].mxu0  ;;  %v490_v9 = vadd.f32 %v1331_v61, %v1711_v33 }
 0x10d   : > { %v485_v8 = vadd.f32 %v1711_v33, %v484_v62 }
 0x10f   : > { %1249 = vmatmul.mubr.msk.f32.gmra.mrb[12].mxu1 %vm507_vm1, %v455_v60  ;;  %v1334_v63 = vpop.f32.mrb[18].mxu0  ;;  %v1815_v60 = vld [vmem:[%s2006_s4] ss:$0 sm:$0xff] }
 0x110   : > { %698 = vmatprep.mubr.f32.mxu1 %v1572_v32  ;;  %v500_v0 = vadd.f32 %v1334_v63, %v1711_v33  ;;  %v494_v1 = vpop.f32.mrb[19].mxu0 }
 0x111   : > { %v495_v3 = vadd.f32 %v1711_v33, %v494_v1 }
 0x113   : > { %1250 = vmatmul.mubr.msk.f32.gmra.mrb[14].mxu1 %vm507_vm1, %v460_v2 }
 0x114   : > { %704 = vmatprep.mubr.f32.mxu1 %v1572_v32 }
 0x117   : > { %1251 = vmatmul.mubr.msk.f32.gmra.mrb[16].mxu1 %vm507_vm1, %v465_v4 }
 0x118   : > { %710 = vmatprep.mubr.f32.mxu1 %v1572_v32 }
 0x11b   : > { %1252 = vmatmul.mubr.msk.f32.gmra.mrb[18].mxu1 %vm507_vm1, %v470_v5 }
 0x11c   : > { %716 = vmatprep.mubr.f32.mxu1 %v1572_v32 }
 0x11f   : > { %1253 = vmatmul.mubr.msk.f32.gmra.mrb[20].mxu1 %vm507_vm1, %v475_v6 }
 0x120   : > { %722 = vmatprep.mubr.f32.mxu1 %v1572_v32 }
 0x123   : > { %1254 = vmatmul.mubr.msk.f32.gmra.mrb[22].mxu1 %vm507_vm1, %v480_v7 }
 0x124   : > { %728 = vmatprep.mubr.f32.mxu1 %v1572_v32 }
 0x127   : > { %1255 = vmatmul.mubr.msk.f32.gmra.mrb[24].mxu1 %vm507_vm1, %v485_v8 }
 0x128   : > { %734 = vmatprep.mubr.f32.mxu1 %v1572_v32 }
 0x12b   : > { %1256 = vmatmul.mubr.msk.f32.gmra.mrb[26].mxu1 %vm507_vm1, %v490_v9 }
 0x12c   : > { %740 = vmatprep.mubr.f32.mxu1 %v1572_v32 }
 0x12f   : > { %1257 = vmatmul.mubr.msk.f32.gmra.mrb[28].mxu1 %vm507_vm1, %v495_v3 }
 0x130   : > { %746 = vmatprep.mubr.f32.mxu1 %v1572_v32 }
 0x133   : > { %1258 = vmatmul.mubr.msk.f32.gmra.mrb[30].mxu1 %vm507_vm1, %v500_v0 }
 0x1c2   : > { %v634_v10 = vpop.f32.mrb[20].mxu0 }
 0x1c3   : > { %753 = vmax.xlane.f32.xlu0 %v634_v10  ;;  %v1771_v11 = vpop.f32.mrb[21].mxu0 }
 0x1c6   : > { %v640_v12 = vpop.f32.mrb[22].mxu0 }
 0x1c7   : > { %755 = vmax.xlane.f32.xlu0 %v640_v12  ;;  %v1773_v13 = vpop.f32.mrb[23].mxu0 }
 0x1ca   : > { %v646_v14 = vpop.f32.mrb[24].mxu0  ;;  %v658_v15 = vpop.f32.mrb[0].mxu1 }
 0x1cb   : > { %v1775_v16 = vpop.f32.mrb[1].mxu1  ;;  %761 = vmax.xlane.f32.xlu0 %v658_v15  ;;  %757 = vmax.xlane.f32.xlu1 %v646_v14  ;;  %v1777_v17 = vpop.f32.mrb[25].mxu0 }
 0x1ce   : > { %v652_v18 = vpop.f32.mrb[26].mxu0  ;;  %v664_v19 = vpop.f32.mrb[2].mxu1 }
 0x1cf   : > { %v1779_v20 = vpop.f32.mrb[3].mxu1  ;;  %759 = vmax.xlane.f32.xlu1 %v652_v18  ;;  %v1781_v21 = vpop.f32.mrb[27].mxu0 }
 0x1d2   : > { %v670_v22 = vpop.f32.mrb[4].mxu1 }
 0x1d3   : > { %v1783_v23 = vpop.f32.mrb[5].mxu1  ;;  %765 = vmax.xlane.f32.xlu0 %v670_v22  ;;  %763 = vmax.xlane.f32.xlu1 %v664_v19 }
 0x1d6   : > { %v676_v24 = vpop.f32.mrb[6].mxu1 }
 0x1d7   : > { %v1785_v25 = vpop.f32.mrb[7].mxu1  ;;  %767 = vmax.xlane.f32.xlu1 %v676_v24 }
 0x1da   : > { %v682_v26 = vpop.f32.mrb[8].mxu1 }
 0x1db   : > { %v1787_v27 = vpop.f32.mrb[9].mxu1  ;;  %769 = vmax.xlane.f32.xlu0 %v682_v26 }
 0x1de   : > { %v688_v28 = vpop.f32.mrb[10].mxu1 }
 0x1df   : > { %v1789_v29 = vpop.f32.mrb[11].mxu1  ;;  %771 = vmax.xlane.f32.xlu1 %v688_v28 }
 0x1e2   : > { %v694_v30 = vpop.f32.mrb[12].mxu1 }
 0x1e3   : > { %v1791_v31 = vpop.f32.mrb[13].mxu1  ;;  %773 = vmax.xlane.f32.xlu0 %v694_v30 }
 0x1e6   : > { %v700_v32 = vpop.f32.mrb[14].mxu1 }
 0x1e7   : > { %v1793_v33 = vpop.f32.mrb[15].mxu1  ;;  %775 = vmax.xlane.f32.xlu1 %v700_v32 }
 0x1ea   : > { %v706_v34 = vpop.f32.mrb[16].mxu1 }
 0x1eb   : > { %v1795_v35 = vpop.f32.mrb[17].mxu1  ;;  %777 = vmax.xlane.f32.xlu0 %v706_v34 }
 0x1ee   : > { %v712_v36 = vpop.f32.mrb[18].mxu1 }
 0x1ef   : > { %v1797_v37 = vpop.f32.mrb[19].mxu1  ;;  %779 = vmax.xlane.f32.xlu1 %v712_v36 }
 0x1f2   : > { %v718_v38 = vpop.f32.mrb[20].mxu1 }
 0x1f3   : > { %v1799_v39 = vpop.f32.mrb[21].mxu1  ;;  %781 = vmax.xlane.f32.xlu0 %v718_v38 }
 0x1f6   : > { %v724_v40 = vpop.f32.mrb[22].mxu1 }
 0x1f7   : > { %v1801_v41 = vpop.f32.mrb[23].mxu1  ;;  %783 = vmax.xlane.f32.xlu1 %v724_v40 }
 0x1fa   : > { %v730_v42 = vpop.f32.mrb[24].mxu1 }
 0x1fb   : > { %v1803_v43 = vpop.f32.mrb[25].mxu1  ;;  %785 = vmax.xlane.f32.xlu0 %v730_v42 }
 0x1fe   : > { %v736_v44 = vpop.f32.mrb[26].mxu1 }
 0x1ff   : > { %v1805_v45 = vpop.f32.mrb[27].mxu1  ;;  %787 = vmax.xlane.f32.xlu1 %v736_v44 }
 0x202   : > { %v742_v46 = vpop.f32.mrb[28].mxu1 }
 0x203   : > { %v1807_v47 = vpop.f32.mrb[29].mxu1  ;;  %789 = vmax.xlane.f32.xlu0 %v742_v46 }
 0x206   : > { %v748_v48 = vpop.f32.mrb[30].mxu1 }
 0x207   : > { %v1809_v49 = vpop.f32.mrb[31].mxu1  ;;  %791 = vmax.xlane.f32.xlu1 %v748_v48 }
 0x250   : > { %v754_v50 = vpop.xlane.xlu0 %753 }
 0x251   : > { %v793_v51 = vmax.f32 %v754_v50, 1.0 }
 0x253   : > { %1440 = vrcp.f32 %v793_v51 }
 0x254   : > { %v756_v52 = vpop.xlane.xlu0 %755 }
 0x255   : > { %v794_v53 = vmax.f32 %v756_v52, 1.0 }
 0x257   : > { %1442 = vrcp.f32 %v794_v53 }
 0x258   : > { %v762_v54 = vpop.xlane.xlu0 %761  ;;  %v758_v55 = vpop.xlane.xlu1 %757 }
 0x259   : > { %v797_v56 = vmax.f32 %v762_v54, 1.0  ;;  %v795_v57 = vmax.f32 %v758_v55, 1.0 }
 0x25b   : > { %1444 = vrcp.f32 %v797_v56 }
 0x25c   : > { %1446 = vrcp.f32 %v795_v57  ;;  %v760_v58 = vpop.xlane.xlu1 %759 }
 0x25d   : > { %v1441_v59 = vpop.eup %1440  ;;  %v796_v61 = vmax.f32 %v760_v58, 1.0 }
 0x25e   : > { %v853_v62 = vmul.f32 %v1441_v59, %v1771_v11 }
 0x25f   : > { %1448 = vrcp.f32 %v796_v61 }
 0x260   : > { %v880_v63 = vadd.f32 %v1815_v60, %v853_v62  ;;  %v766_v0 = vpop.xlane.xlu0 %765  ;;  %v764_v1 = vpop.xlane.xlu1 %763 }
 0x261   : > { %v1443_v2 = vpop.eup %1442  ;;  %v799_v3 = vmax.f32 %v766_v0, 1.0  ;;  %v798_v4 = vmax.f32 %v764_v1, 1.0 }
 0x262   : > { %900 = vst.msk [vmem:[%s1819_s18] sm:$0xff] %vm277_vm0, %v880_v63  ;;  %v854_v5 = vmul.f32 %v1443_v2, %v1773_v13 }
 0x263   : > { %1450 = vrcp.f32 %v799_v3 }
 0x264   : > { %v881_v6 = vadd.f32 %v1815_v60, %v854_v5  ;;  %1452 = vrcp.f32 %v798_v4  ;;  %v768_v7 = vpop.xlane.xlu1 %767 }
 0x265   : > { %v1445_v8 = vpop.eup %1444  ;;  %v800_v9 = vmax.f32 %v768_v7, 1.0 }
 0x266   : > { %v1447_v10 = vpop.eup %1446  ;;  %901 = vst.msk [vmem:[%s1819_s18 + $0x8] sm:$0xff] %vm277_vm0, %v881_v6  ;;  %v857_v11 = vmul.f32 %v1445_v8, %v1775_v16 }
 0x267   : > { %v855_v12 = vmul.f32 %v1447_v10, %v1777_v17  ;;  %1454 = vrcp.f32 %v800_v9 }
 0x268   : > { %v884_v13 = vadd.f32 %v1815_v60, %v857_v11  ;;  %v770_v14 = vpop.xlane.xlu0 %769 }
 0x269   : > { %v1449_v15 = vpop.eup %1448  ;;  %v882_v18 = vadd.f32 %v1815_v60, %v855_v12  ;;  %v801_v19 = vmax.f32 %v770_v14, 1.0 }
 0x26a   : > { %904 = vst.msk [vmem:[%s1819_s18 + $0x20] sm:$0xff] %vm277_vm0, %v884_v13  ;;  %v856_v22 = vmul.f32 %v1449_v15, %v1781_v21 }
 0x26b   : > { %902 = vst.msk [vmem:[%s1819_s18 + $0x10] sm:$0xff] %vm277_vm0, %v882_v18  ;;  %1456 = vrcp.f32 %v801_v19 }
 0x26c   : > { %v883_v16 = vadd.f32 %v1815_v60, %v856_v22  ;;  %v772_v17 = vpop.xlane.xlu1 %771 }
 0x26d   : > { %v1451_v24 = vpop.eup %1450  ;;  %v802_v26 = vmax.f32 %v772_v17, 1.0 }
 0x26e   : > { %v1453_v28 = vpop.eup %1452  ;;  %903 = vst.msk [vmem:[%s1819_s18 + $0x18] sm:$0xff] %vm277_vm0, %v883_v16  ;;  %v859_v30 = vmul.f32 %v1451_v24, %v1783_v23 }
 0x26f   : > { %v858_v32 = vmul.f32 %v1453_v28, %v1779_v20  ;;  %1458 = vrcp.f32 %v802_v26 }
 0x270   : > { %v886_v21 = vadd.f32 %v1815_v60, %v859_v30  ;;  %v774_v34 = vpop.xlane.xlu0 %773 }
 0x271   : > { %v1455_v36 = vpop.eup %1454  ;;  %v885_v38 = vadd.f32 %v1815_v60, %v858_v32  ;;  %v803_v40 = vmax.f32 %v774_v34, 1.0 }
 0x272   : > { %906 = vst.msk [vmem:[%s1819_s18 + $0x30] sm:$0xff] %vm277_vm0, %v886_v21  ;;  %v860_v42 = vmul.f32 %v1455_v36, %v1785_v25 }
 0x273   : > { %905 = vst.msk [vmem:[%s1819_s18 + $0x28] sm:$0xff] %vm277_vm0, %v885_v38  ;;  %1460 = vrcp.f32 %v803_v40 }
 0x274   : > { %v887_v23 = vadd.f32 %v1815_v60, %v860_v42  ;;  %v776_v44 = vpop.xlane.xlu1 %775 }
 0x275   : > { %v1457_v20 = vpop.eup %1456  ;;  %v804_v46 = vmax.f32 %v776_v44, 1.0 }
 0x276   : > { %907 = vst.msk [vmem:[%s1819_s18 + $0x38] sm:$0xff] %vm277_vm0, %v887_v23  ;;  %v861_v48 = vmul.f32 %v1457_v20, %v1787_v27 }
 0x277   : > { %1462 = vrcp.f32 %v804_v46 }
 0x278   : > { %v888_v50 = vadd.f32 %v1815_v60, %v861_v48  ;;  %v778_v51 = vpop.xlane.xlu0 %777 }
 0x279   : > { %v1459_v52 = vpop.eup %1458  ;;  %v805_v25 = vmax.f32 %v778_v51, 1.0 }
 0x27a   : > { %908 = vst.msk [vmem:[%s1819_s18 + $0x40] sm:$0xff] %vm277_vm0, %v888_v50  ;;  %v862_v53 = vmul.f32 %v1459_v52, %v1789_v29 }
 0x27b   : > { %1464 = vrcp.f32 %v805_v25 }
 0x27c   : > { %v889_v54 = vadd.f32 %v1815_v60, %v862_v53  ;;  %v780_v55 = vpop.xlane.xlu1 %779 }
 0x27d   : > { %v1461_v56 = vpop.eup %1460  ;;  %v806_v57 = vmax.f32 %v780_v55, 1.0 }
 0x27e   : > { %909 = vst.msk [vmem:[%s1819_s18 + $0x48] sm:$0xff] %vm277_vm0, %v889_v54  ;;  %v863_v27 = vmul.f32 %v1461_v56, %v1791_v31 }
 0x27f   : > { %1466 = vrcp.f32 %v806_v57 }
 0x280   : > { %v890_v58 = vadd.f32 %v1815_v60, %v863_v27  ;;  %v782_v59 = vpop.xlane.xlu0 %781 }
 0x281   : > { %v1463_v61 = vpop.eup %1462  ;;  %v807_v62 = vmax.f32 %v782_v59, 1.0 }
 0x282   : > { %910 = vst.msk [vmem:[%s1819_s18 + $0x50] sm:$0xff] %vm277_vm0, %v890_v58  ;;  %v864_v29 = vmul.f32 %v1463_v61, %v1793_v33 }
 0x283   : > { %1468 = vrcp.f32 %v807_v62 }
 0x284   : > { %v891_v63 = vadd.f32 %v1815_v60, %v864_v29  ;;  %v784_v0 = vpop.xlane.xlu1 %783 }
 0x285   : > { %v1465_v1 = vpop.eup %1464  ;;  %v808_v2 = vmax.f32 %v784_v0, 1.0 }
 0x286   : > { %911 = vst.msk [vmem:[%s1819_s18 + $0x58] sm:$0xff] %vm277_vm0, %v891_v63  ;;  %v865_v31 = vmul.f32 %v1465_v1, %v1795_v35 }
 0x287   : > { %1470 = vrcp.f32 %v808_v2 }
 0x288   : > { %v892_v3 = vadd.f32 %v1815_v60, %v865_v31  ;;  %v786_v4 = vpop.xlane.xlu0 %785 }
 0x289   : > { %v1467_v5 = vpop.eup %1466  ;;  %v809_v6 = vmax.f32 %v786_v4, 1.0 }
 0x28a   : > { %912 = vst.msk [vmem:[%s1819_s18 + $0x60] sm:$0xff] %vm277_vm0, %v892_v3  ;;  %v866_v33 = vmul.f32 %v1467_v5, %v1797_v37 }
 0x28b   : > { %1472 = vrcp.f32 %v809_v6 }
 0x28c   : > { %v893_v7 = vadd.f32 %v1815_v60, %v866_v33  ;;  %v788_v8 = vpop.xlane.xlu1 %787 }
 0x28d   : > { %v1469_v9 = vpop.eup %1468  ;;  %v810_v10 = vmax.f32 %v788_v8, 1.0 }
 0x28e   : > { %913 = vst.msk [vmem:[%s1819_s18 + $0x68] sm:$0xff] %vm277_vm0, %v893_v7  ;;  %v867_v35 = vmul.f32 %v1469_v9, %v1799_v39 }
 0x28f   : > { %1474 = vrcp.f32 %v810_v10 }
 0x290   : > { %v894_v11 = vadd.f32 %v1815_v60, %v867_v35  ;;  %v790_v12 = vpop.xlane.xlu0 %789 }
 0x291   : > { %v1471_v13 = vpop.eup %1470  ;;  %v811_v14 = vmax.f32 %v790_v12, 1.0 }
 0x292   : > { %914 = vst.msk [vmem:[%s1819_s18 + $0x70] sm:$0xff] %vm277_vm0, %v894_v11  ;;  %v868_v37 = vmul.f32 %v1471_v13, %v1801_v41 }
 0x293   : > { %1476 = vrcp.f32 %v811_v14 }
 0x294   : > { %v895_v15 = vadd.f32 %v1815_v60, %v868_v37  ;;  %v792_v18 = vpop.xlane.xlu1 %791 }
 0x295   : > { %v1473_v19 = vpop.eup %1472  ;;  %v812_v22 = vmax.f32 %v792_v18, 1.0 }
 0x296   : > { %915 = vst.msk [vmem:[%s1819_s18 + $0x78] sm:$0xff] %vm277_vm0, %v895_v15  ;;  %v869_v39 = vmul.f32 %v1473_v19, %v1803_v43 }
 0x297   : > { %1478 = vrcp.f32 %v812_v22 }
 0x298   : > { %v896_v16 = vadd.f32 %v1815_v60, %v869_v39 }
 0x299   : > { %v1475_v17 = vpop.eup %1474 }
 0x29a   : > { %916 = vst.msk [vmem:[%s1819_s18 + $0x80] sm:$0xff] %vm277_vm0, %v896_v16  ;;  %v870_v41 = vmul.f32 %v1475_v17, %v1805_v45 }
 0x29c   : > { %v897_v24 = vadd.f32 %v1815_v60, %v870_v41 }
 0x29d   : > { %v1477_v26 = vpop.eup %1476 }
 0x29e   : > { %917 = vst.msk [vmem:[%s1819_s18 + $0x88] sm:$0xff] %vm277_vm0, %v897_v24  ;;  %v871_v28 = vmul.f32 %v1477_v26, %v1807_v47 }
 0x2a0   : > { %v898_v30 = vadd.f32 %v1815_v60, %v871_v28  ;;  %926 = sbr.rel (!%p1628_p4) target bundleno = 742 (0x2e6), region = 44 }
 0x2a1   : > { %v1479_v32 = vpop.eup %1478 }
 0x2a2   : > { %918 = vst.msk [vmem:[%s1819_s18 + $0x90] sm:$0xff] %vm277_vm0, %v898_v30  ;;  %v872_v43 = vmul.f32 %v1479_v32, %v1809_v49 }
 0x2a4   : > { %v899_v21 = vadd.f32 %v1815_v60, %v872_v43 }
 0x2a6   : > { %919 = vst.msk [vmem:[%s1819_s18 + $0x98] sm:$0xff] %vm277_vm0, %v899_v21 }
 0x2a7   : > { %s2016_s12 = smov (!%p929_p8, %s928_s12), 20 }
 0x2a8   : > { %s1260_s17 = sshll.u32 %s2016_s12, 7 }
 0x2a9   : > { %p1263_p9 = scmp.eq.s32.totalorder %s1260_s17, 0 }
 0x2aa   : > { %1480 = sdivrem.u32 (!%p1263_p9), %s2016_s12, 20 }
 0x2ab   : > { %937 = sbr.rel (%p1263_p9) target bundleno = 742 (0x2e6), region = 48 }
 0x2b3   : > { %s1912_s26 = spop.drf %1480 }
 0x2b4   : > { %p1264_p10 = scmp.le.s32.totalorder %s1912_s26, 0 }
 0x2b5   : > { %s2009_s21 = smov (!%p1264_p10), %s1906_s16  ;;  %s2010_s8 = smov (!%p1264_p10), %s1819_s18 }
 0x2b6   : > { %1169 = sbr.rel (%p1264_p10) target bundleno = 713 (0x2c9), region = 124  ;;  %s1921_s20 = smov (!%p1264_p10), 0  }
 0x2b7   : > { %s1923_s23 = smov (!%p1264_p10), 0  }
 0x2bd LB: >> { %v1039_v45 = vld [vmem:[%s1546_s8] sm:$0xff]  ;;  %v1041_v47 = vld [vmem:[%s1546_s8 + $0x8] sm:$0xff]  ;;  %v1043_v49 = vld [vmem:[%s1546_s8 + $0x10] sm:$0xff]  ;;  %s1079_s24 = sadd.s32 1, %s1550_s20  ;;  %s1033_s23 = sadd.s32 1, %s1554_s23   ;;  %s1554_s23 = sphi %s1923_s23, %s1033_s23   ;;  %s1550_s20 = sphi %s1921_s20, %s2011_s20   ;;  %s1546_s8 = sphi %s2010_s8, %s1084_s8   ;;  %s1542_s21 = sphi %s2009_s21, %s1085_s21  }
 0x2be   : >> { %1040 = vst [vmem:[%s1542_s21] sm:$0xff] %v1039_v45  ;;  %1042 = vst [vmem:[%s1542_s21 + $0x8] sm:$0xff] %v1041_v47  ;;  %v1045_v60 = vld [vmem:[%s1546_s8 + $0x18] sm:$0xff]  ;;  %v1047_v34 = vld [vmem:[%s1546_s8 + $0x20] sm:$0xff]  ;;  %p1080_p11 = scmp.ge.s32.totalorder %s1079_s24, %s1912_s26  ;;  %p1032_p12 = scmp.ge.s32.totalorder %s1033_s23, %s1912_s26 }
 0x2bf   : >> { %1044 = vst [vmem:[%s1542_s21 + $0x10] sm:$0xff] %v1043_v49  ;;  %v1049_v36 = vld [vmem:[%s1546_s8 + $0x28] sm:$0xff]  ;;  %1046 = vst [vmem:[%s1542_s21 + $0x18] sm:$0xff] %v1045_v60  ;;  %v1051_v38 = vld [vmem:[%s1546_s8 + $0x30] sm:$0xff] }
 0x2c0   : >> { %1048 = vst [vmem:[%s1542_s21 + $0x20] sm:$0xff] %v1047_v34  ;;  %1050 = vst [vmem:[%s1542_s21 + $0x28] sm:$0xff] %v1049_v36  ;;  %v1053_v40 = vld [vmem:[%s1546_s8 + $0x38] sm:$0xff]  ;;  %v1055_v42 = vld [vmem:[%s1546_s8 + $0x40] sm:$0xff]  ;;  %s2018_s24 = smov (%p1080_p11, %s1079_s24), 0 }
 0x2c1   : >> { %1052 = vst [vmem:[%s1542_s21 + $0x30] sm:$0xff] %v1051_v38  ;;  %1054 = vst [vmem:[%s1542_s21 + $0x38] sm:$0xff] %v1053_v40  ;;  %v1057_v23 = vld [vmem:[%s1546_s8 + $0x48] sm:$0xff]  ;;  %v1059_v44 = vld [vmem:[%s1546_s8 + $0x50] sm:$0xff]  ;;  %s1082_s27 = smul.u32 160, %s2018_s24  ;;  %s2011_s20 = smov %s2018_s24 }
 0x2c2   : >> { %1056 = vst [vmem:[%s1542_s21 + $0x40] sm:$0xff] %v1055_v42  ;;  %v1061_v20 = vld [vmem:[%s1546_s8 + $0x58] sm:$0xff]  ;;  %1058 = vst [vmem:[%s1542_s21 + $0x48] sm:$0xff] %v1057_v23  ;;  %v1063_v46 = vld [vmem:[%s1546_s8 + $0x60] sm:$0xff]  ;;  %1035 = sbr.rel (!%p1032_p12) target bundleno = 701 (0x2bd), region = 130 }
 0x2c3   : >> { %1060 = vst [vmem:[%s1542_s21 + $0x50] sm:$0xff] %v1059_v44  ;;  %1062 = vst [vmem:[%s1542_s21 + $0x58] sm:$0xff] %v1061_v20  ;;  %v1065_v48 = vld [vmem:[%s1546_s8 + $0x68] sm:$0xff]  ;;  %v1067_v50 = vld [vmem:[%s1546_s8 + $0x70] sm:$0xff] }
 0x2c4   : >> { %1064 = vst [vmem:[%s1542_s21 + $0x60] sm:$0xff] %v1063_v46  ;;  %1066 = vst [vmem:[%s1542_s21 + $0x68] sm:$0xff] %v1065_v48  ;;  %v1069_v51 = vld [vmem:[%s1546_s8 + $0x78] sm:$0xff]  ;;  %v1071_v52 = vld [vmem:[%s1546_s8 + $0x80] sm:$0xff] }
 0x2c5   : >> { %1068 = vst [vmem:[%s1542_s21 + $0x70] sm:$0xff] %v1067_v50  ;;  %v1073_v25 = vld [vmem:[%s1546_s8 + $0x88] sm:$0xff]  ;;  %1070 = vst [vmem:[%s1542_s21 + $0x78] sm:$0xff] %v1069_v51  ;;  %v1075_v53 = vld [vmem:[%s1546_s8 + $0x90] sm:$0xff] }
 0x2c6   : >> { %1072 = vst [vmem:[%s1542_s21 + $0x80] sm:$0xff] %v1071_v52  ;;  %1074 = vst [vmem:[%s1542_s21 + $0x88] sm:$0xff] %v1073_v25  ;;  %v1077_v54 = vld [vmem:[%s1546_s8 + $0x98] sm:$0xff]  ;;  %s1084_s8 = scalar_lea.vmem %s1819_s18, %s1082_s27 [#allocation2]  }
 0x2c7   : >> { %1076 = vst [vmem:[%s1542_s21 + $0x90] sm:$0xff] %v1075_v53  ;;  %1078 = vst [vmem:[%s1542_s21 + $0x98] sm:$0xff] %v1077_v54  ;;  %s1085_s21 = scalar_lea.vmem %s1906_s16, %s1082_s27  }
 0x2c9 PF: > { %1482 = sdivrem.u32 %s2016_s12, 20 }
 0x2ca   : > { %s1265_s28 = smul.u32 160, %s1912_s26 }
 0x2cc   : > { %s1090_s29 = scalar_lea.vmem %s1819_s18, %s1265_s28 [#allocation2]   ;;  %s1092_s30 = scalar_lea.vmem %s1906_s16, %s1265_s28  }
 0x2d2   : > { %s1483_s6 = spop.drf %1482 }
 0x2d3   : > { %p1267_p13 = scmp.le.s32.totalorder %s1483_s6, 0 }
 0x2d4   : > { %s1556_s7 = smov (!%p1267_p13), %s1092_s30   ;;  %s1560_s9 = smov (!%p1267_p13), %s1090_s29  }
 0x2d5   : > { %1183 = sbr.rel (%p1267_p13) target bundleno = 742 (0x2e6), region = 135  ;;  %s1564_s10 = smov (!%p1267_p13), 0  }
 0x2d6   : > { %s1568_s11 = smov (!%p1267_p13), 0  }
 0x2dc LB: >> { %v1102_v55 = vld [vmem:[%s1562_s9] sm:$0xff]  ;;  %s1104_s13 = sadd.s32 1, %s1566_s10  ;;  %s1096_s11 = sadd.s32 1, %s1570_s11   ;;  %s1570_s11 = sphi %s1568_s11, %s1096_s11   ;;  %s1566_s10 = sphi %s1564_s10, %s1565_s10   ;;  %s1562_s9 = sphi %s1560_s9, %s1109_s9   ;;  %s1558_s7 = sphi %s1556_s7, %s1110_s7  }
 0x2dd   : >> { %1103 = vst [vmem:[%s1558_s7] sm:$0xff] %v1102_v55  ;;  %p1105_p0 = scmp.ge.s32.totalorder %s1104_s13, %s1483_s6  ;;  %p1095_p1 = scmp.ge.s32.totalorder %s1096_s11, %s1483_s6 }
 0x2df   : >> { %s2020_s13 = smov (%p1105_p0, %s1104_s13), 0  ;;  %1098 = sbr.rel (!%p1095_p1) target bundleno = 732 (0x2dc), region = 141 }
 0x2e0   : >> { %s1268_s18 = sshll.u32 %s2020_s13, 3  ;;  %s1565_s10 = smov %s2020_s13  }
 0x2e1   : >> { %s1109_s9 = scalar_lea.vmem %s1090_s29, %s1268_s18 [#allocation2]   ;;  %s1110_s7 = scalar_lea.vmem %s1092_s30, %s1268_s18  }
 0x2e6 PF: > { %p12_p2 = scmp.ge.s32.totalorder %s1618_s22, 4   ;;  %s2012_s18 = smov %s1534_s19 }
 0x2e7   : > { %s2013_s19 = smov %s1626_s25  ;;  %s2014_s20 = smov %s1618_s22 }
 0x2e8   :  { %14 = sbr.rel (!%p12_p2) target bundleno = 2 (0x2), region = 152 }

</bundles_post_ra>
